<compile_context>
chip_gen: v6e
topology: v6e:2x2x1
jax: 0.10.0
libtpu: 0.0.40
codegen_flags: <defaults>
</compile_context>

<pallas_src>
import functools

import jax
import jax.numpy as jnp
from jax.experimental import pallas as pl
from jax.experimental.pallas import tpu as pltpu

IN_DIM = 100
IN_PAD = 128          # lane-aligned K for layer 1
H1 = 256
H2 = 512
OUT_DIM = 28 * 28     # 784


def _round_up(x, m):
    return ((x + m - 1) // m) * m


def generator_kernel(x_ref, w1_ref, b1_ref, w2_ref, b2_ref, w3_ref, b3_ref,
                     out_ref):
    # Layer 1: Linear(128->256) + ReLU   (bf16 inputs, f32 accumulation)
    h1 = jnp.dot(x_ref[...], w1_ref[...], preferred_element_type=jnp.float32)
    h1 = jnp.maximum(h1 + b1_ref[0, :], 0.0)
    # Layer 2: Linear(256->512) + ReLU
    h2 = jnp.dot(h1.astype(w2_ref.dtype), w2_ref[...],
                 preferred_element_type=jnp.float32)
    h2 = jnp.maximum(h2 + b2_ref[0, :], 0.0)
    # Layer 3: Linear(512->784) + Tanh
    h3 = jnp.dot(h2.astype(w3_ref.dtype), w3_ref[...],
                 preferred_element_type=jnp.float32)
    out_ref[...] = jnp.tanh(h3 + b3_ref[0, :]).astype(out_ref.dtype)


def generator_forward(x, params, *, batch_tile=None, out_dtype=jnp.float32):
    """x: (B, 100) float32 -> (B, 28, 28, 1) out_dtype (default float32)."""
    w1, b1, w2, b2, w3, b3 = params
    B = x.shape[0]

    # ---- host/XLA-side prep (fused under jit): pad K 100->128, cast to bf16 --
    x_p = jnp.pad(x, ((0, 0), (0, IN_PAD - IN_DIM))).astype(jnp.bfloat16)
    w1_p = jnp.pad(w1, ((0, IN_PAD - IN_DIM), (0, 0))).astype(jnp.bfloat16)
    w2_b = w2.astype(jnp.bfloat16)
    w3_b = w3.astype(jnp.bfloat16)
    b1_f = b1.astype(jnp.float32)
    b2_f = b2.astype(jnp.float32)
    b3_f = b3.astype(jnp.float32)

    # ---- adaptive batch tile: fill the MXU, keep VMEM footprint small --------
    if batch_tile is None:
        batch_tile = min(256, _round_up(B, 8))
    batch_tile = max(8, _round_up(batch_tile, 8))
    B_pad = _round_up(B, batch_tile)
    if B_pad != B:
        x_p = jnp.pad(x_p, ((0, B_pad - B), (0, 0)))
    grid = (B_pad // batch_tile,)

    def full_spec(shape):
        return pl.BlockSpec(shape, lambda i: tuple(0 for _ in shape))

    out_bytes = jnp.dtype(out_dtype).itemsize
    weight_bytes = 2 * (IN_PAD * H1 + H1 * H2 + H2 * OUT_DIM) + 4 * (H1 + H2 + OUT_DIM)
    cost = pl.CostEstimate(
        flops=2 * B_pad * (IN_PAD * H1 + H1 * H2 + H2 * OUT_DIM),
        transcendentals=B_pad * OUT_DIM,
        bytes_accessed=B_pad * (IN_PAD * 2 + OUT_DIM * out_bytes) + weight_bytes,
    )

    out_flat = pl.pallas_call(
        generator_kernel,
        out_shape=jax.ShapeDtypeStruct((B_pad, OUT_DIM), out_dtype),
        grid_spec=pltpu.PrefetchScalarGridSpec(
            num_scalar_prefetch=0,
            grid=grid,
            in_specs=[
                pl.BlockSpec((batch_tile, IN_PAD), lambda i: (i, 0)),  # x tile
                full_spec(w1_p.shape),
                full_spec(b1_f.shape),
                full_spec(w2_b.shape),
                full_spec(b2_f.shape),
                full_spec(w3_b.shape),
                full_spec(b3_f.shape),
            ],
            out_specs=pl.BlockSpec((batch_tile, OUT_DIM), lambda i: (i, 0)),
        ),
        compiler_params=pltpu.CompilerParams(
            dimension_semantics=("parallel",)),
        cost_estimate=cost,
    )(x_p, w1_p, b1_f, w2_b, b2_f, w3_b, b3_f)

    # Glue: same semantics as torch `img.view(-1, 28, 28, 1)`
    return out_flat[:B].reshape(-1, 28, 28, 1)


def init_params(key):
    """Init mimicking nn.Linear's U(-1/sqrt(fan_in), 1/sqrt(fan_in)).

    Weights are stored transposed relative to torch ((in, out) instead of
    (out, in)) so the kernel can do x @ W directly; biases are (1, out).
    """
    keys = jax.random.split(key, 6)

    def linear(kw, kb, fan_in, fan_out):
        bound = 1.0 / jnp.sqrt(fan_in)
        w = jax.random.uniform(kw, (fan_in, fan_out), jnp.float32,
                               minval=-bound, maxval=bound)
        b = jax.random.uniform(kb, (1, fan_out), jnp.float32,
                               minval=-bound, maxval=bound)
        return w, b

    w1, b1 = linear(keys[0], keys[1], IN_DIM, H1)
    w2, b2 = linear(keys[2], keys[3], H1, H2)
    w3, b3 = linear(keys[4], keys[5], H2, OUT_DIM)
    return (w1, b1, w2, b2, w3, b3)


def reference_forward(x, params):
    w1, b1, w2, b2, w3, b3 = params
    h1 = jnp.maximum(x @ w1 + b1, 0.0)
    h2 = jnp.maximum(h1 @ w2 + b2, 0.0)
    return jnp.tanh(h2 @ w3 + b3).reshape(-1, 28, 28, 1)


if __name__ == "__main__":
    key = jax.random.PRNGKey(0)
    k_params, k_x = jax.random.split(key)

    params = init_params(k_params)
    batch = 8
    x = jax.random.normal(k_x, (batch, IN_DIM), jnp.float32)

    fwd = jax.jit(functools.partial(generator_forward, out_dtype=jnp.float32))
    img = fwd(x, params)
    img = jax.block_until_ready(img)

    assert img.shape == (batch, 28, 28, 1), img.shape

    # bf16 matmul inputs with f32 accumulation => looser tolerance vs f32 ref.
    ref = reference_forward(x, params)
    assert jnp.allclose(img, ref, atol=5e-2, rtol=5e-2), (
        "mismatch vs reference; max abs diff = "
        f"{float(jnp.max(jnp.abs(img - ref)))}")

    print("KERNEL_OK")
</pallas_src>

<mosaic_0001>
module attributes {stable_mosaic.version = 11 : i64} {
  func.func @generator_kernel(%arg0: i32, %arg1: memref<8x128xbf16, #tpu.memory_space<vmem>>, %arg2: memref<128x256xbf16, #tpu.memory_space<vmem>>, %arg3: memref<1x256xf32, #tpu.memory_space<vmem>>, %arg4: memref<256x512xbf16, #tpu.memory_space<vmem>>, %arg5: memref<1x512xf32, #tpu.memory_space<vmem>>, %arg6: memref<512x784xbf16, #tpu.memory_space<vmem>>, %arg7: memref<1x784xf32, #tpu.memory_space<vmem>>, %arg8: memref<8x784xf32, #tpu.memory_space<vmem>>) attributes {dimension_semantics = [#tpu.dimension_semantics<parallel>], iteration_bounds = array<i64: 1>, scalar_prefetch = 0 : i64, scratch_operands = 0 : i64, tpu.core_type = #tpu.core_type<tc>, window_params = [{transform_indices = @transform_0, window_bounds = array<i64: 8, 128>}, {pipeline_mode = #tpu.pipeline_mode<synchronous>, transform_indices = @transform_1, window_bounds = array<i64: 128, 256>}, {pipeline_mode = #tpu.pipeline_mode<synchronous>, transform_indices = @transform_2, window_bounds = array<i64: 1, 256>}, {pipeline_mode = #tpu.pipeline_mode<synchronous>, transform_indices = @transform_3, window_bounds = array<i64: 256, 512>}, {pipeline_mode = #tpu.pipeline_mode<synchronous>, transform_indices = @transform_4, window_bounds = array<i64: 1, 512>}, {pipeline_mode = #tpu.pipeline_mode<synchronous>, transform_indices = @transform_5, window_bounds = array<i64: 512, 784>}, {pipeline_mode = #tpu.pipeline_mode<synchronous>, transform_indices = @transform_6, window_bounds = array<i64: 1, 784>}, {transform_indices = @transform_7, window_bounds = array<i64: 8, 784>}]} {
    %c0 = arith.constant 0 : index
    %c0_0 = arith.constant 0 : index
    %0 = vector.load %arg1[%c0, %c0_0] : memref<8x128xbf16, #tpu.memory_space<vmem>>, vector<8x128xbf16>
    %c0_1 = arith.constant 0 : index
    %c0_2 = arith.constant 0 : index
    %1 = vector.load %arg2[%c0_1, %c0_2] : memref<128x256xbf16, #tpu.memory_space<vmem>>, vector<128x256xbf16>
    %cst = arith.constant dense<0.000000e+00> : vector<8x256xf32>
    %2 = tpu.matmul %0, %1, %cst {dimension_numbers = #tpu.dot_dimension_numbers<[1], [0], [0], [1], [0, 0, 1, 1], [], []>} : vector<8x128xbf16>, vector<128x256xbf16>, vector<8x256xf32> -> vector<8x256xf32>
    %c0_3 = arith.constant 0 : index
    %c0_4 = arith.constant 0 : index
    %3 = vector.load %arg3[%c0_3, %c0_4] : memref<1x256xf32, #tpu.memory_space<vmem>>, vector<1x256xf32>
    %4 = vector.shape_cast %3 : vector<1x256xf32> to vector<256xf32>
    %5 = vector.shape_cast %4 : vector<256xf32> to vector<1x256xf32>
    %6 = vector.broadcast %5 : vector<1x256xf32> to vector<8x256xf32>
    %7 = arith.addf %2, %6 : vector<8x256xf32>
    %cst_5 = arith.constant 0.000000e+00 : f32
    %8 = vector.broadcast %cst_5 : f32 to vector<8x256xf32>
    %9 = arith.maximumf %7, %8 : vector<8x256xf32>
    %10 = arith.truncf %9 : vector<8x256xf32> to vector<8x256xbf16>
    %c0_6 = arith.constant 0 : index
    %c0_7 = arith.constant 0 : index
    %11 = vector.load %arg4[%c0_6, %c0_7] : memref<256x512xbf16, #tpu.memory_space<vmem>>, vector<256x512xbf16>
    %cst_8 = arith.constant dense<0.000000e+00> : vector<8x512xf32>
    %12 = tpu.matmul %10, %11, %cst_8 {dimension_numbers = #tpu.dot_dimension_numbers<[1], [0], [0], [1], [0, 0, 1, 1], [], []>} : vector<8x256xbf16>, vector<256x512xbf16>, vector<8x512xf32> -> vector<8x512xf32>
    %c0_9 = arith.constant 0 : index
    %c0_10 = arith.constant 0 : index
    %13 = vector.load %arg5[%c0_9, %c0_10] : memref<1x512xf32, #tpu.memory_space<vmem>>, vector<1x512xf32>
    %14 = vector.shape_cast %13 : vector<1x512xf32> to vector<512xf32>
    %15 = vector.shape_cast %14 : vector<512xf32> to vector<1x512xf32>
    %16 = vector.broadcast %15 : vector<1x512xf32> to vector<8x512xf32>
    %17 = arith.addf %12, %16 : vector<8x512xf32>
    %cst_11 = arith.constant 0.000000e+00 : f32
    %18 = vector.broadcast %cst_11 : f32 to vector<8x512xf32>
    %19 = arith.maximumf %17, %18 : vector<8x512xf32>
    %20 = arith.truncf %19 : vector<8x512xf32> to vector<8x512xbf16>
    %c0_12 = arith.constant 0 : index
    %c0_13 = arith.constant 0 : index
    %21 = vector.load %arg6[%c0_12, %c0_13] : memref<512x784xbf16, #tpu.memory_space<vmem>>, vector<512x784xbf16>
    %cst_14 = arith.constant dense<0.000000e+00> : vector<8x784xf32>
    %22 = tpu.matmul %20, %21, %cst_14 {dimension_numbers = #tpu.dot_dimension_numbers<[1], [0], [0], [1], [0, 0, 1, 1], [], []>} : vector<8x512xbf16>, vector<512x784xbf16>, vector<8x784xf32> -> vector<8x784xf32>
    %c0_15 = arith.constant 0 : index
    %c0_16 = arith.constant 0 : index
    %23 = vector.load %arg7[%c0_15, %c0_16] : memref<1x784xf32, #tpu.memory_space<vmem>>, vector<1x784xf32>
    %24 = vector.shape_cast %23 : vector<1x784xf32> to vector<784xf32>
    %25 = vector.shape_cast %24 : vector<784xf32> to vector<1x784xf32>
    %26 = vector.broadcast %25 : vector<1x784xf32> to vector<8x784xf32>
    %27 = arith.addf %22, %26 : vector<8x784xf32>
    %28 = math.tanh %27 : vector<8x784xf32>
    %c0_17 = arith.constant 0 : index
    %c0_18 = arith.constant 0 : index
    %29 = vector.load %arg8[%c0_17, %c0_18] : memref<8x784xf32, #tpu.memory_space<vmem>>, vector<8x784xf32>
    tpu.vector_store %arg8[%c0_17, %c0_18], %28 {strides = array<i32>} : memref<8x784xf32, #tpu.memory_space<vmem>>, vector<8x784xf32>,
    return
  }
  func.func @transform_0(%arg0: i32) -> (i32, i32) {
    %c0_i32 = arith.constant 0 : i32
    %c0_i32_0 = arith.constant 0 : i32
    return %arg0, %c0_i32 : i32, i32
  }
  func.func @transform_1(%arg0: i32) -> (i32, i32) {
    %c0_i32 = arith.constant 0 : i32
    %c0_i32_0 = arith.constant 0 : i32
    %c0_i32_1 = arith.constant 0 : i32
    return %c0_i32, %c0_i32_0 : i32, i32
  }
  func.func @transform_2(%arg0: i32) -> (i32, i32) {
    %c0_i32 = arith.constant 0 : i32
    %c0_i32_0 = arith.constant 0 : i32
    %c0_i32_1 = arith.constant 0 : i32
    return %c0_i32, %c0_i32_0 : i32, i32
  }
  func.func @transform_3(%arg0: i32) -> (i32, i32) {
    %c0_i32 = arith.constant 0 : i32
    %c0_i32_0 = arith.constant 0 : i32
    %c0_i32_1 = arith.constant 0 : i32
    return %c0_i32, %c0_i32_0 : i32, i32
  }
  func.func @transform_4(%arg0: i32) -> (i32, i32) {
    %c0_i32 = arith.constant 0 : i32
    %c0_i32_0 = arith.constant 0 : i32
    %c0_i32_1 = arith.constant 0 : i32
    return %c0_i32, %c0_i32_0 : i32, i32
  }
  func.func @transform_5(%arg0: i32) -> (i32, i32) {
    %c0_i32 = arith.constant 0 : i32
    %c0_i32_0 = arith.constant 0 : i32
    %c0_i32_1 = arith.constant 0 : i32
    return %c0_i32, %c0_i32_0 : i32, i32
  }
  func.func @transform_6(%arg0: i32) -> (i32, i32) {
    %c0_i32 = arith.constant 0 : i32
    %c0_i32_0 = arith.constant 0 : i32
    %c0_i32_1 = arith.constant 0 : i32
    return %c0_i32, %c0_i32_0 : i32, i32
  }
  func.func @transform_7(%arg0: i32) -> (i32, i32) {
    %c0_i32 = arith.constant 0 : i32
    %c0_i32_0 = arith.constant 0 : i32
    return %arg0, %c0_i32 : i32, i32
  }
}

</mosaic_0001>

<bundles_post_ra>
// kernel: generator_forward.1
= control target key start
LH: loop header
LB: loop body
LE: loop exit
PB: predicated region body
PF: predicated region fallthrough
CT: control target
= control target key end

     0   :  { %v3270_v1 = vmov 0   ;;  %vm2461_vm0 = vcmask 130048   ;;  %s4316_s1 = inlined_call_operand.vmem [shape: bf16[128,256], index: 1, kind: input, shape index: {}]   ;;  %s4317_s3 = inlined_call_operand.vmem [shape: bf16[256,512], index: 3, kind: input, shape index: {}]   ;;  %s4318_s0 = inlined_call_operand.vmem [shape: bf16[8,128], index: 0, kind: input, shape index: {}]   ;;  %s4319_s5 = inlined_call_operand.vmem [shape: bf16[512,784], index: 5, kind: input, shape index: {}]   ;;  %s4320_s2 = inlined_call_operand.vmem [shape: f32[1,256], index: 2, kind: input, shape index: {}]   ;;  %s4321_s4 = inlined_call_operand.vmem [shape: f32[1,512], index: 4, kind: input, shape index: {}]   ;;  %s4322_s6 = inlined_call_operand.vmem [shape: f32[1,784], index: 6, kind: input, shape index: {}]   ;;  %s4323_s7 = inlined_call_operand.vmem [shape: f32[8,784], index: 7, kind: output, shape index: {}]  }
   0x1   :  { %v2816_v0 = vld [vmem:[%s4316_s1 + $0x74] ss:$8 sps:$4 sm:$0xff]   ;;  %168 = vmatprep.mubr.bf16.mxu0 %v3270_v1  ;;  %v2818_v2 = vld [vmem:[%s4316_s1 + $0x70] ss:$8 sps:$4 sm:$0xff]   ;;  %v2819_v3 = vld [vmem:[%s4316_s1 + $0x64] ss:$8 sps:$4 sm:$0xff]  }
   0x2   :  { %136 = vmatprep.subr.bf16.mxu0 %v2816_v0  ;;  %v2821_v4 = vld [vmem:[%s4316_s1 + $0x60] ss:$8 sps:$4 sm:$0xff]   ;;  %v2822_v5 = vld [vmem:[%s4316_s1 + $0x54] ss:$8 sps:$4 sm:$0xff]   ;;  %v2824_v6 = vld [vmem:[%s4316_s1 + $0x50] ss:$8 sps:$4 sm:$0xff]  }
   0x3   :  { %137 = vmatpush1.bf16.msra.mxu0 %v2818_v2  ;;  %v2825_v7 = vld [vmem:[%s4316_s1 + $0x44] ss:$8 sps:$4 sm:$0xff]   ;;  %v2827_v8 = vld [vmem:[%s4316_s1 + $0x40] ss:$8 sps:$4 sm:$0xff]   ;;  %v2828_v10 = vld [vmem:[%s4316_s1 + $0x34] ss:$8 sps:$4 sm:$0xff]  }
   0x4   :  { %138 = vmatprep.subr.bf16.mxu0 %v2819_v3  ;;  %v2840_v9 = vld [vmem:[%s4317_s3 + $0xe4] ss:$16 sps:$4 sm:$0xff]   ;;  %v2845_v11 = vld [vmem:[%s4317_s3 + $0xe0] ss:$16 sps:$4 sm:$0xff]   ;;  %v2844_v26 = vld [vmem:[%s4317_s3 + $0xec] ss:$16 sps:$4 sm:$0xff]  }
   0x5   :  { %587 = vmatprep.subr.bf16.mxu1 %v2840_v9  ;;  %v2846_v12 = vld [vmem:[%s4317_s3 + $0xc4] ss:$16 sps:$4 sm:$0xff]   ;;  %v2830_v13 = vld [vmem:[%s4316_s1 + $0x30] ss:$8 sps:$4 sm:$0xff]   ;;  %v2833_v17 = vld [vmem:[%s4316_s1 + $0x20] ss:$8 sps:$4 sm:$0xff]  }
   0x6   :  { %v2831_v14 = vld [vmem:[%s4316_s1 + $0x24] ss:$8 sps:$4 sm:$0xff]   ;;  %588 = vmatpush1.bf16.msra.mxu1 %v2845_v11  ;;  %v2851_v15 = vld [vmem:[%s4317_s3 + $0xc0] ss:$16 sps:$4 sm:$0xff]   ;;  %v2834_v18 = vld [vmem:[%s4316_s1 + $0x14] ss:$8 sps:$4 sm:$0xff]  }
   0x7   :  { %139 = vmatpush1.bf16.msra.mxu0 %v2821_v4  ;;  %589 = vmatprep.subr.bf16.mxu1 %v2846_v12  ;;  %v2852_v16 = vld [vmem:[%s4317_s3 + $0xa4] ss:$16 sps:$4 sm:$0xff]   ;;  %v2857_v19 = vld [vmem:[%s4317_s3 + $0xa0] ss:$16 sps:$4 sm:$0xff]   ;;  %v2842_v30 = vld [vmem:[%s4317_s3 + $0xe8] ss:$16 sps:$4 sm:$0xff]  }
   0x8   :  { %140 = vmatprep.subr.bf16.mxu0 %v2822_v5  ;;  %v2858_v20 = vld [vmem:[%s4317_s3 + $0x84] ss:$16 sps:$4 sm:$0xff]   ;;  %v2836_v21 = vld [vmem:[%s4316_s1 + $0x10] ss:$8 sps:$4 sm:$0xff]   ;;  %v2839_v25 = vld [vmem:[%s4316_s1] ss:$8 sps:$4 sm:$0xff]  }
   0x9   :  { %v2837_v22 = vld [vmem:[%s4316_s1 + $0x4] ss:$8 sps:$4 sm:$0xff]   ;;  %v2863_v23 = vld [vmem:[%s4317_s3 + $0x80] ss:$16 sps:$4 sm:$0xff]   ;;  %v2848_v34 = vld [vmem:[%s4317_s3 + $0xc8] ss:$16 sps:$4 sm:$0xff]  }
   0xa   :  { %590 = vmatpush1.bf16.msra.mxu1 %v2851_v15  ;;  %v2864_v24 = vld [vmem:[%s4317_s3 + $0x64] ss:$16 sps:$4 sm:$0xff]   ;;  %v2869_v27 = vld [vmem:[%s4317_s3 + $0x60] ss:$16 sps:$4 sm:$0xff]   ;;  %v2850_v31 = vld [vmem:[%s4317_s3 + $0xcc] ss:$16 sps:$4 sm:$0xff]  }
   0xb   :  { %141 = vmatpush1.bf16.msra.mxu0 %v2824_v6  ;;  %591 = vmatprep.subr.bf16.mxu1 %v2852_v16  ;;  %v2870_v28 = vld [vmem:[%s4317_s3 + $0x44] ss:$16 sps:$4 sm:$0xff]   ;;  %v27_v29 = vld [vmem:[%s4318_s0] sm:$0xf]  ;;  %v2856_v35 = vld [vmem:[%s4317_s3 + $0xac] ss:$16 sps:$4 sm:$0xff]  }
   0xc   :  { %142 = vmatprep.subr.bf16.mxu0 %v2825_v7  ;;  %v2875_v32 = vld [vmem:[%s4317_s3 + $0x40] ss:$16 sps:$4 sm:$0xff]   ;;  %v2876_v33 = vld [vmem:[%s4317_s3 + $0x24] ss:$16 sps:$4 sm:$0xff]   ;;  %v2854_v38 = vld [vmem:[%s4317_s3 + $0xa8] ss:$16 sps:$4 sm:$0xff]  }
   0xd   :  { %v2881_v36 = vld [vmem:[%s4317_s3 + $0x20] ss:$16 sps:$4 sm:$0xff]   ;;  %v2882_v37 = vld [vmem:[%s4317_s3 + $0x4] ss:$16 sps:$4 sm:$0xff]   ;;  %v2862_v39 = vld [vmem:[%s4317_s3 + $0x8c] ss:$16 sps:$4 sm:$0xff]  }
   0xe   :  { %592 = vmatpush1.bf16.msra.mxu1 %v2857_v19  ;;  %v2887_v40 = vld [vmem:[%s4317_s3] ss:$16 sps:$4 sm:$0xff]   ;;  %v2888_v41 = vld [vmem:[%s4317_s3 + $0x1e4] ss:$16 sps:$4 sm:$0xff]   ;;  %v2860_v42 = vld [vmem:[%s4317_s3 + $0x88] ss:$16 sps:$4 sm:$0xff]  }
   0xf   :  { %143 = vmatpush1.bf16.msra.mxu0 %v2827_v8  ;;  %593 = vmatprep.subr.bf16.mxu1 %v2858_v20  ;;  %v2868_v43 = vld [vmem:[%s4317_s3 + $0x6c] ss:$16 sps:$4 sm:$0xff]   ;;  %v2893_v44 = vld [vmem:[%s4317_s3 + $0x1e0] ss:$16 sps:$4 sm:$0xff]   ;;  %v2894_v45 = vld [vmem:[%s4317_s3 + $0x1c4] ss:$16 sps:$4 sm:$0xff]   ;;  %v46_v20 = vlaneseq }
  0x10   :  { %144 = vmatprep.subr.bf16.mxu0 %v2828_v10  ;;  %v2866_v46 = vld [vmem:[%s4317_s3 + $0x68] ss:$16 sps:$4 sm:$0xff]   ;;  %v2899_v47 = vld [vmem:[%s4317_s3 + $0x1c0] ss:$16 sps:$4 sm:$0xff]   ;;  %v2874_v48 = vld [vmem:[%s4317_s3 + $0x4c] ss:$16 sps:$4 sm:$0xff]  }
  0x11   :  { %v2900_v49 = vld [vmem:[%s4317_s3 + $0x1a4] ss:$16 sps:$4 sm:$0xff]   ;;  %v2872_v50 = vld [vmem:[%s4317_s3 + $0x48] ss:$16 sps:$4 sm:$0xff]   ;;  %v2905_v51 = vld [vmem:[%s4317_s3 + $0x1a0] ss:$16 sps:$4 sm:$0xff]  }
  0x12   :  { %594 = vmatpush1.bf16.msra.mxu1 %v2863_v23  ;;  %v2880_v52 = vld [vmem:[%s4317_s3 + $0x2c] ss:$16 sps:$4 sm:$0xff]   ;;  %v2906_v53 = vld [vmem:[%s4317_s3 + $0x184] ss:$16 sps:$4 sm:$0xff]   ;;  %v2878_v54 = vld [vmem:[%s4317_s3 + $0x28] ss:$16 sps:$4 sm:$0xff]  }
  0x13   :  { %145 = vmatpush1.bf16.msra.mxu0 %v2830_v13  ;;  %595 = vmatprep.subr.bf16.mxu1 %v2864_v24  ;;  %v2911_v55 = vld [vmem:[%s4317_s3 + $0x180] ss:$16 sps:$4 sm:$0xff]   ;;  %v2886_v56 = vld [vmem:[%s4317_s3 + $0xc] ss:$16 sps:$4 sm:$0xff]   ;;  %v2912_v57 = vld [vmem:[%s4317_s3 + $0x164] ss:$16 sps:$4 sm:$0xff]  }
  0x14   :  { %146 = vmatprep.subr.bf16.mxu0 %v2831_v14  ;;  %v2884_v58 = vld [vmem:[%s4317_s3 + $0x8] ss:$16 sps:$4 sm:$0xff]   ;;  %v2917_v59 = vld [vmem:[%s4317_s3 + $0x160] ss:$16 sps:$4 sm:$0xff]   ;;  %v2892_v60 = vld [vmem:[%s4317_s3 + $0x1ec] ss:$16 sps:$4 sm:$0xff]  }
  0x15   :  { %v2918_v61 = vld [vmem:[%s4317_s3 + $0x144] ss:$16 sps:$4 sm:$0xff]   ;;  %v2890_v62 = vld [vmem:[%s4317_s3 + $0x1e8] ss:$16 sps:$4 sm:$0xff]   ;;  %v2923_v63 = vld [vmem:[%s4317_s3 + $0x140] ss:$16 sps:$4 sm:$0xff]  }
  0x16   :  { %596 = vmatpush1.bf16.msra.mxu1 %v2869_v27  ;;  %v2898_v0 = vld [vmem:[%s4317_s3 + $0x1cc] ss:$16 sps:$4 sm:$0xff]   ;;  %v2896_v1 = vld [vmem:[%s4317_s3 + $0x1c8] ss:$16 sps:$4 sm:$0xff]   ;;  %v2924_v10 = vld [vmem:[%s4317_s3 + $0x124] ss:$16 sps:$4 sm:$0xff]  }
  0x17   :  { %147 = vmatpush1.bf16.msra.mxu0 %v2833_v17  ;;  %597 = vmatprep.subr.bf16.mxu1 %v2870_v28  ;;  %v2904_v2 = vld [vmem:[%s4317_s3 + $0x1ac] ss:$16 sps:$4 sm:$0xff]   ;;  %v2902_v3 = vld [vmem:[%s4317_s3 + $0x1a8] ss:$16 sps:$4 sm:$0xff]   ;;  %v2929_v13 = vld [vmem:[%s4317_s3 + $0x120] ss:$16 sps:$4 sm:$0xff]  }
  0x18   :  { %148 = vmatprep.subr.bf16.mxu0 %v2834_v18  ;;  %v2910_v4 = vld [vmem:[%s4317_s3 + $0x18c] ss:$16 sps:$4 sm:$0xff]   ;;  %v2908_v5 = vld [vmem:[%s4317_s3 + $0x188] ss:$16 sps:$4 sm:$0xff]   ;;  %v2930_v14 = vld [vmem:[%s4317_s3 + $0x104] ss:$16 sps:$4 sm:$0xff]  }
  0x19   :  { %v2916_v6 = vld [vmem:[%s4317_s3 + $0x16c] ss:$16 sps:$4 sm:$0xff]   ;;  %v2914_v7 = vld [vmem:[%s4317_s3 + $0x168] ss:$16 sps:$4 sm:$0xff]   ;;  %v2935_v17 = vld [vmem:[%s4317_s3 + $0x100] ss:$16 sps:$4 sm:$0xff]  }
  0x1a   :  { %598 = vmatpush1.bf16.msra.mxu1 %v2875_v32  ;;  %v2922_v8 = vld [vmem:[%s4317_s3 + $0x14c] ss:$16 sps:$4 sm:$0xff]   ;;  %v2920_v9 = vld [vmem:[%s4317_s3 + $0x148] ss:$16 sps:$4 sm:$0xff]   ;;  %v44_v23 = vld [vmem:[%s4320_s2] sm:$0x3] }
  0x1b   :  { %149 = vmatpush1.bf16.msra.mxu0 %v2836_v21  ;;  %599 = vmatprep.subr.bf16.mxu1 %v2876_v33  ;;  %v2928_v11 = vld [vmem:[%s4317_s3 + $0x12c] ss:$16 sps:$4 sm:$0xff]   ;;  %v2926_v12 = vld [vmem:[%s4317_s3 + $0x128] ss:$16 sps:$4 sm:$0xff]   ;;  %v3560_v21 = vshrl.u32 %v46_v20, 7 }
  0x1c   :  { %150 = vmatprep.subr.bf16.mxu0 %v2837_v22  ;;  %v2934_v15 = vld [vmem:[%s4317_s3 + $0x10c] ss:$16 sps:$4 sm:$0xff]   ;;  %v2932_v16 = vld [vmem:[%s4317_s3 + $0x108] ss:$16 sps:$4 sm:$0xff]  }
  0x1d   :  { %v2938_v18 = vld [vmem:[%s4319_s5 + $0x18c] ss:$28 sps:$4 sm:$0xff]   ;;  %v3563_v22 = vsub.s32 0, %v3560_v21  ;;  %v3569_v24 = vsub.s32 1, %v3560_v21 }
  0x1e   :  { %600 = vmatpush1.bf16.msra.mxu1 %v2881_v36  ;;  %v2941_v19 = vld [vmem:[%s4319_s5 + $0x50c] ss:$28 sps:$4 sm:$0xff]  }
  0x1f   :  { %151 = vmatpush1.bf16.msra.mxu0 %v2839_v25  ;;  %601 = vmatprep.subr.bf16.mxu1 %v2882_v37  ;;  %v49_v25 = vrot.slane %v44_v23, %v3563_v22  ;;  %v2936_v36 = vld [vmem:[%s4319_s5 + $0x188] ss:$28 sps:$4 sm:$0xff]  }
  0x20   :  { %628 = vmatprep.subr.bf16.mxu0 %v2844_v26  ;;  %v53_v26 = vrot.slane %v44_v23, %v3569_v24  ;;  %v2939_v37 = vld [vmem:[%s4319_s5 + $0x508] ss:$28 sps:$4 sm:$0xff]  }
  0x21   :  { %v3013_v20 = vld [vmem:[%s4319_s5 + $0x5ec] ss:$28 sps:$4 sm:$0xff]  }
  0x22   :  { %169 = vmatmul.mubr.bf16.vlgmr.msra.gmra.mxu0 %v27_v29  ;;  %602 = vmatpush1.bf16.msra.mxu1 %v2887_v40  ;;  %v2947_v40 = vld [vmem:[%s4319_s5 + $0x4d4] ss:$28 sps:$4 sm:$0xff]   ;;  %v3008_v23 = vld [vmem:[%s4319_s5 + $0x268] ss:$28 sps:$4 sm:$0xff]  }
  0x23   :  { %629 = vmatpush1.bf16.msra.mxu0 %v2842_v30  ;;  %603 = vmatprep.subr.bf16.mxu1 %v2888_v41  ;;  %v2942_v41 = vld [vmem:[%s4319_s5 + $0x150] ss:$28 sps:$4 sm:$0xff]  }
  0x24   :  { %630 = vmatprep.subr.bf16.mxu0 %v2850_v31 }
  0x26   :  { %604 = vmatpush2.bf16.msra.mxu1 %v2893_v44  ;;  %v2953_v44 = vld [vmem:[%s4319_s5 + $0x49c] ss:$28 sps:$4 sm:$0xff]  }
  0x27   :  { %631 = vmatpush1.bf16.msra.mxu0 %v2848_v34  ;;  %605 = vmatprep.subr.bf16.mxu1 %v2894_v45  ;;  %v2948_v45 = vld [vmem:[%s4319_s5 + $0x118] ss:$28 sps:$4 sm:$0xff]  }
  0x28   :  { %632 = vmatprep.subr.bf16.mxu0 %v2856_v35 }
  0x2a   :  { %606 = vmatpush2.bf16.msra.mxu1 %v2899_v47  ;;  %v2956_v47 = vld [vmem:[%s4319_s5 + $0xe4] ss:$28 sps:$4 sm:$0xff]  }
  0x2b   :  { %633 = vmatpush1.bf16.msra.mxu0 %v2854_v38  ;;  %607 = vmatprep.subr.bf16.mxu1 %v2900_v49  ;;  %v2954_v49 = vld [vmem:[%s4319_s5 + $0xe0] ss:$28 sps:$4 sm:$0xff]  }
  0x2c   :  { %634 = vmatprep.subr.bf16.mxu0 %v2862_v39  ;;  %v2944_v39 = vld [vmem:[%s4319_s5 + $0x154] ss:$28 sps:$4 sm:$0xff]  }
  0x2e   :  { %608 = vmatpush2.bf16.msra.mxu1 %v2905_v51  ;;  %v2962_v51 = vld [vmem:[%s4319_s5 + $0xac] ss:$28 sps:$4 sm:$0xff]  }
  0x2f   :  { %635 = vmatpush1.bf16.msra.mxu0 %v2860_v42  ;;  %609 = vmatprep.subr.bf16.mxu1 %v2906_v53  ;;  %v2945_v42 = vld [vmem:[%s4319_s5 + $0x4d0] ss:$28 sps:$4 sm:$0xff]   ;;  %v2960_v53 = vld [vmem:[%s4319_s5 + $0xa8] ss:$28 sps:$4 sm:$0xff]  }
  0x30   :  { %636 = vmatprep.subr.bf16.mxu0 %v2868_v43  ;;  %v2950_v43 = vld [vmem:[%s4319_s5 + $0x11c] ss:$28 sps:$4 sm:$0xff]  }
  0x32   :  { %610 = vmatpush2.bf16.msra.mxu1 %v2911_v55  ;;  %v2968_v55 = vld [vmem:[%s4319_s5 + $0x74] ss:$28 sps:$4 sm:$0xff]  }
  0x33   :  { %637 = vmatpush1.bf16.msra.mxu0 %v2866_v46  ;;  %611 = vmatprep.subr.bf16.mxu1 %v2912_v57  ;;  %v2951_v46 = vld [vmem:[%s4319_s5 + $0x498] ss:$28 sps:$4 sm:$0xff]   ;;  %v2966_v57 = vld [vmem:[%s4319_s5 + $0x70] ss:$28 sps:$4 sm:$0xff]  }
  0x34   :  { %638 = vmatprep.subr.bf16.mxu0 %v2874_v48  ;;  %v2959_v48 = vld [vmem:[%s4319_s5 + $0x464] ss:$28 sps:$4 sm:$0xff]  }
  0x36   :  { %612 = vmatpush2.bf16.msra.mxu1 %v2917_v59  ;;  %v2974_v59 = vld [vmem:[%s4319_s5 + $0x3c] ss:$28 sps:$4 sm:$0xff]  }
  0x37   :  { %639 = vmatpush1.bf16.msra.mxu0 %v2872_v50  ;;  %613 = vmatprep.subr.bf16.mxu1 %v2918_v61  ;;  %v2957_v50 = vld [vmem:[%s4319_s5 + $0x460] ss:$28 sps:$4 sm:$0xff]   ;;  %v2972_v61 = vld [vmem:[%s4319_s5 + $0x38] ss:$28 sps:$4 sm:$0xff]  }
  0x38   :  { %640 = vmatprep.subr.bf16.mxu0 %v2880_v52  ;;  %v2965_v52 = vld [vmem:[%s4319_s5 + $0x42c] ss:$28 sps:$4 sm:$0xff]  }
  0x3a   :  { %614 = vmatpush2.bf16.msra.mxu1 %v2923_v63  ;;  %v2980_v63 = vld [vmem:[%s4319_s5 + $0x4] ss:$28 sps:$4 sm:$0xff]  }
  0x3b   :  { %641 = vmatpush1.bf16.msra.mxu0 %v2878_v54  ;;  %615 = vmatprep.subr.bf16.mxu1 %v2924_v10  ;;  %v2963_v54 = vld [vmem:[%s4319_s5 + $0x428] ss:$28 sps:$4 sm:$0xff]   ;;  %v2993_v10 = vld [vmem:[%s4319_s5 + $0x690] ss:$28 sps:$4 sm:$0xff]  }
  0x3c   :  { %642 = vmatprep.subr.bf16.mxu0 %v2886_v56  ;;  %v2971_v56 = vld [vmem:[%s4319_s5 + $0x3f4] ss:$28 sps:$4 sm:$0xff]  }
  0x3e   :  { %616 = vmatpush2.bf16.msra.mxu1 %v2929_v13  ;;  %v2996_v13 = vld [vmem:[%s4319_s5 + $0x2d8] ss:$28 sps:$4 sm:$0xff]  }
  0x3f   :  { %643 = vmatpush1.bf16.msra.mxu0 %v2884_v58  ;;  %617 = vmatprep.subr.bf16.mxu1 %v2930_v14  ;;  %v2969_v58 = vld [vmem:[%s4319_s5 + $0x3f0] ss:$28 sps:$4 sm:$0xff]   ;;  %v2999_v14 = vld [vmem:[%s4319_s5 + $0x658] ss:$28 sps:$4 sm:$0xff]  }
  0x40   :  { %644 = vmatprep.subr.bf16.mxu0 %v2892_v60  ;;  %v2977_v60 = vld [vmem:[%s4319_s5 + $0x3bc] ss:$28 sps:$4 sm:$0xff]  }
  0x42   :  { %618 = vmatpush2.bf16.msra.mxu1 %v2935_v17  ;;  %v3002_v17 = vld [vmem:[%s4319_s5 + $0x2a0] ss:$28 sps:$4 sm:$0xff]  }
  0x43   :  { %645 = vmatpush2.bf16.msra.mxu0 %v2890_v62  ;;  %2122 = vmatprep.subr.bf16.mxu1 %v2938_v18  ;;  %v2975_v62 = vld [vmem:[%s4319_s5 + $0x3b8] ss:$28 sps:$4 sm:$0xff]   ;;  %v3005_v18 = vld [vmem:[%s4319_s5 + $0x620] ss:$28 sps:$4 sm:$0xff]  }
  0x44   :  { %646 = vmatprep.subr.bf16.mxu0 %v2898_v0  ;;  %v2983_v0 = vld [vmem:[%s4319_s5 + $0x384] ss:$28 sps:$4 sm:$0xff]  }
  0x47   :  { %647 = vmatpush2.bf16.msra.mxu0 %v2896_v1  ;;  %v2978_v1 = vld [vmem:[%s4319_s5] ss:$28 sps:$4 sm:$0xff]  }
  0x48   :  { %648 = vmatprep.subr.bf16.mxu0 %v2904_v2  ;;  %v2981_v2 = vld [vmem:[%s4319_s5 + $0x380] ss:$28 sps:$4 sm:$0xff]  }
  0x4b   :  { %649 = vmatpush2.bf16.msra.mxu0 %v2902_v3  ;;  %v2986_v3 = vld [vmem:[%s4319_s5 + $0x34c] ss:$28 sps:$4 sm:$0xff]  }
  0x4c   :  { %650 = vmatprep.subr.bf16.mxu0 %v2910_v4  ;;  %v2989_v4 = vld [vmem:[%s4319_s5 + $0x6cc] ss:$28 sps:$4 sm:$0xff]  }
  0x4f   :  { %651 = vmatpush2.bf16.msra.mxu0 %v2908_v5  ;;  %v2984_v5 = vld [vmem:[%s4319_s5 + $0x348] ss:$28 sps:$4 sm:$0xff]  }
  0x50   :  { %652 = vmatprep.subr.bf16.mxu0 %v2916_v6  ;;  %v2987_v6 = vld [vmem:[%s4319_s5 + $0x6c8] ss:$28 sps:$4 sm:$0xff]  }
  0x53   :  { %653 = vmatpush2.bf16.msra.mxu0 %v2914_v7  ;;  %v2992_v7 = vld [vmem:[%s4319_s5 + $0x314] ss:$28 sps:$4 sm:$0xff]  }
  0x54   :  { %654 = vmatprep.subr.bf16.mxu0 %v2922_v8  ;;  %v2995_v8 = vld [vmem:[%s4319_s5 + $0x694] ss:$28 sps:$4 sm:$0xff]  }
  0x57   :  { %655 = vmatpush2.bf16.msra.mxu0 %v2920_v9  ;;  %v2990_v9 = vld [vmem:[%s4319_s5 + $0x310] ss:$28 sps:$4 sm:$0xff]  }
  0x58   :  { %656 = vmatprep.subr.bf16.mxu0 %v2928_v11  ;;  %v2998_v11 = vld [vmem:[%s4319_s5 + $0x2dc] ss:$28 sps:$4 sm:$0xff]  }
  0x5b   :  { %657 = vmatpush2.bf16.msra.mxu0 %v2926_v12  ;;  %v3001_v12 = vld [vmem:[%s4319_s5 + $0x65c] ss:$28 sps:$4 sm:$0xff]  }
  0x5c   :  { %658 = vmatprep.subr.bf16.mxu0 %v2934_v15  ;;  %v3004_v15 = vld [vmem:[%s4319_s5 + $0x2a4] ss:$28 sps:$4 sm:$0xff]  }
  0x5f   :  { %659 = vmatpush2.bf16.msra.mxu0 %v2932_v16  ;;  %v3007_v16 = vld [vmem:[%s4319_s5 + $0x624] ss:$28 sps:$4 sm:$0xff]  }
  0x60   :  { %2163 = vmatprep.subr.bf16.mxu0 %v2941_v19  ;;  %v3010_v19 = vld [vmem:[%s4319_s5 + $0x26c] ss:$28 sps:$4 sm:$0xff]  }
  0xe2   :  { %v170_v27 = vpop.f32.mrf.mxu0 }
  0xe3   :  { %v171_v28 = vadd.f32 %v170_v27, %v49_v25  ;;  %v3011_v25 = vld [vmem:[%s4319_s5 + $0x5e8] ss:$28 sps:$4 sm:$0xff]   ;;  %v3019_v27 = vld [vmem:[%s4319_s5 + $0x5b4] ss:$28 sps:$4 sm:$0xff]  }
  0xe4   :  { %v172_v29 = vpop.f32.mrf.mxu0 }
  0xe5   :  { %v173_v30 = vadd.f32 %v172_v29, %v53_v26  ;;  %v177_v31 = vmax.f32 %v171_v28, 0.0  ;;  %v3016_v26 = vld [vmem:[%s4319_s5 + $0x234] ss:$28 sps:$4 sm:$0xff]  }
  0xe6   :  { %v174_v32 = vpop.f32.mrf.mxu0  ;;  %v3014_v28 = vld [vmem:[%s4319_s5 + $0x230] ss:$28 sps:$4 sm:$0xff]  }
  0xe7   :  { %v178_v33 = vmax.f32 %v173_v30, 0.0  ;;  %v179_v38 = vpack.c.bf16 %v177_v31, %v177_v31  ;;  %v3017_v29 = vld [vmem:[%s4319_s5 + $0x5b0] ss:$28 sps:$4 sm:$0xff]   ;;  %v3022_v30 = vld [vmem:[%s4319_s5 + $0x1fc] ss:$28 sps:$4 sm:$0xff]  }
  0xe8   :  { %v175_v34 = vpop.f32.mrf.mxu0  ;;  %v3025_v31 = vld [vmem:[%s4319_s5 + $0x57c] ss:$28 sps:$4 sm:$0xff]  }
  0xe9   :  { %v180_v35 = vpack.c.bf16 %v178_v33, %v178_v33  ;;  %v3020_v32 = vld [vmem:[%s4319_s5 + $0x1f8] ss:$28 sps:$4 sm:$0xff]   ;;  %v3028_v34 = vld [vmem:[%s4319_s5 + $0x1c4] ss:$28 sps:$4 sm:$0xff]  }
  0xea   :  { %v3023_v33 = vld [vmem:[%s4319_s5 + $0x578] ss:$28 sps:$4 sm:$0xff]  }
  0xeb   :  { %619 = vmatprep.mubr.bf16.mxu1 %v180_v35  ;;  %660 = vmatprep.mubr.bf16.mxu0 %v180_v35  ;;  %v3031_v35 = vld [vmem:[%s4319_s5 + $0x544] ss:$28 sps:$4 sm:$0xff]  }
  0xec   :  { %620 = vmatmul.mubr.bf16.vlgmr.msra.gmra.mxu1 %v179_v38  ;;  %661 = vmatmul.mubr.bf16.vlgmr.msra.gmra.mxu0 %v179_v38  ;;  %v3034_v38 = vld [vmem:[%s4319_s5 + $0x194] ss:$28 sps:$4 sm:$0xff]  }
  0xed   :  { %2123 = vmatpush1.bf16.msra.mxu1 %v2936_v36  ;;  %2164 = vmatpush1.bf16.msra.mxu0 %v2939_v37  ;;  %v3026_v36 = vld [vmem:[%s4319_s5 + $0x1c0] ss:$28 sps:$4 sm:$0xff]  }
  0xee   :  { %2124 = vmatprep.subr.bf16.mxu1 %v2944_v39  ;;  %2165 = vmatprep.subr.bf16.mxu0 %v2947_v40  ;;  %v3029_v37 = vld [vmem:[%s4319_s5 + $0x540] ss:$28 sps:$4 sm:$0xff]   ;;  %v3037_v39 = vld [vmem:[%s4319_s5 + $0x514] ss:$28 sps:$4 sm:$0xff]   ;;  %v257_v40 = vsub.s32 2, %v3560_v21 }
  0xf1   :  { %2125 = vmatpush1.bf16.msra.mxu1 %v2942_v41  ;;  %2166 = vmatpush1.bf16.msra.mxu0 %v2945_v42  ;;  %v245_v41 = vld [vmem:[%s4321_s4] sm:$0xf]  ;;  %v261_v42 = vsub.s32 3, %v3560_v21 }
  0xf2   :  { %2126 = vmatprep.subr.bf16.mxu1 %v2950_v43  ;;  %2167 = vmatprep.subr.bf16.mxu0 %v2953_v44  ;;  %v250_v43 = vrot.slane %v245_v41, %v3563_v22  ;;  %v258_v44 = vrot.slane %v245_v41, %v257_v40 }
  0xf5   :  { %2127 = vmatpush1.bf16.msra.mxu1 %v2948_v45  ;;  %2168 = vmatpush1.bf16.msra.mxu0 %v2951_v46  ;;  %v254_v45 = vrot.slane %v245_v41, %v3569_v24  ;;  %v262_v46 = vrot.slane %v245_v41, %v261_v42  ;;  %v3088_v41 = vld [vmem:[%s4319_s5 + $0x31c] ss:$28 sps:$4 sm:$0xff]  }
  0xf6   :  { %2128 = vmatprep.subr.bf16.mxu1 %v2956_v47  ;;  %2169 = vmatprep.subr.bf16.mxu0 %v2959_v48 }
  0xf9   :  { %2129 = vmatpush1.bf16.msra.mxu1 %v2954_v49  ;;  %2170 = vmatpush1.bf16.msra.mxu0 %v2957_v50 }
  0xfa   :  { %2130 = vmatprep.subr.bf16.mxu1 %v2962_v51  ;;  %2171 = vmatprep.subr.bf16.mxu0 %v2965_v52 }
  0xfd   :  { %2131 = vmatpush1.bf16.msra.mxu1 %v2960_v53  ;;  %2172 = vmatpush1.bf16.msra.mxu0 %v2963_v54 }
  0xfe   :  { %2132 = vmatprep.subr.bf16.mxu1 %v2968_v55  ;;  %2173 = vmatprep.subr.bf16.mxu0 %v2971_v56 }
 0x101   :  { %2133 = vmatpush1.bf16.msra.mxu1 %v2966_v57  ;;  %2174 = vmatpush1.bf16.msra.mxu0 %v2969_v58 }
 0x102   :  { %2134 = vmatprep.subr.bf16.mxu1 %v2974_v59  ;;  %2175 = vmatprep.subr.bf16.mxu0 %v2977_v60 }
 0x105   :  { %2135 = vmatpush1.bf16.msra.mxu1 %v2972_v61  ;;  %2176 = vmatpush1.bf16.msra.mxu0 %v2975_v62 }
 0x106   :  { %2136 = vmatprep.subr.bf16.mxu1 %v2980_v63  ;;  %2177 = vmatprep.subr.bf16.mxu0 %v2983_v0 }
 0x109   :  { %2137 = vmatpush1.bf16.msra.mxu1 %v2978_v1  ;;  %2178 = vmatpush1.bf16.msra.mxu0 %v2981_v2  ;;  %v3032_v1 = vld [vmem:[%s4319_s5 + $0x190] ss:$28 sps:$4 sm:$0xff]  }
 0x10a   :  { %2138 = vmatprep.subr.bf16.mxu1 %v2986_v3  ;;  %2179 = vmatprep.subr.bf16.mxu0 %v2989_v4  ;;  %v3035_v2 = vld [vmem:[%s4319_s5 + $0x510] ss:$28 sps:$4 sm:$0xff]  }
 0x10d   :  { %2139 = vmatpush2.bf16.msra.mxu1 %v2984_v5  ;;  %2180 = vmatpush2.bf16.msra.mxu0 %v2987_v6  ;;  %v3040_v5 = vld [vmem:[%s4319_s5 + $0x15c] ss:$28 sps:$4 sm:$0xff]  }
 0x10e   :  { %2140 = vmatprep.subr.bf16.mxu1 %v2992_v7  ;;  %2181 = vmatprep.subr.bf16.mxu0 %v2995_v8  ;;  %v3043_v6 = vld [vmem:[%s4319_s5 + $0x4dc] ss:$28 sps:$4 sm:$0xff]  }
 0x10f   :  { %v3038_v7 = vld [vmem:[%s4319_s5 + $0x158] ss:$28 sps:$4 sm:$0xff]  }
 0x110   :  { %v3041_v8 = vld [vmem:[%s4319_s5 + $0x4d8] ss:$28 sps:$4 sm:$0xff]  }
 0x111   :  { %2141 = vmatpush2.bf16.msra.mxu1 %v2990_v9  ;;  %2182 = vmatpush2.bf16.msra.mxu0 %v2993_v10  ;;  %v3046_v9 = vld [vmem:[%s4319_s5 + $0x124] ss:$28 sps:$4 sm:$0xff]  }
 0x112   :  { %2142 = vmatprep.subr.bf16.mxu1 %v2998_v11  ;;  %2183 = vmatprep.subr.bf16.mxu0 %v3001_v12  ;;  %v3049_v10 = vld [vmem:[%s4319_s5 + $0x4a4] ss:$28 sps:$4 sm:$0xff]  }
 0x113   :  { %v3044_v11 = vld [vmem:[%s4319_s5 + $0x120] ss:$28 sps:$4 sm:$0xff]  }
 0x114   :  { %v3047_v12 = vld [vmem:[%s4319_s5 + $0x4a0] ss:$28 sps:$4 sm:$0xff]  }
 0x115   :  { %2143 = vmatpush2.bf16.msra.mxu1 %v2996_v13  ;;  %2184 = vmatpush2.bf16.msra.mxu0 %v2999_v14  ;;  %v3052_v13 = vld [vmem:[%s4319_s5 + $0xec] ss:$28 sps:$4 sm:$0xff]  }
 0x116   :  { %2144 = vmatprep.subr.bf16.mxu1 %v3004_v15  ;;  %2185 = vmatprep.subr.bf16.mxu0 %v3007_v16  ;;  %v3055_v14 = vld [vmem:[%s4319_s5 + $0x46c] ss:$28 sps:$4 sm:$0xff]  }
 0x117   :  { %v3050_v15 = vld [vmem:[%s4319_s5 + $0xe8] ss:$28 sps:$4 sm:$0xff]  }
 0x118   :  { %v3053_v16 = vld [vmem:[%s4319_s5 + $0x468] ss:$28 sps:$4 sm:$0xff]  }
 0x119   :  { %2145 = vmatpush2.bf16.msra.mxu1 %v3002_v17  ;;  %2186 = vmatpush2.bf16.msra.mxu0 %v3005_v18  ;;  %v3058_v17 = vld [vmem:[%s4319_s5 + $0xb4] ss:$28 sps:$4 sm:$0xff]  }
 0x11a   :  { %2146 = vmatprep.subr.bf16.mxu1 %v3010_v19  ;;  %2187 = vmatprep.subr.bf16.mxu0 %v3013_v20  ;;  %v3061_v18 = vld [vmem:[%s4319_s5 + $0x434] ss:$28 sps:$4 sm:$0xff]  }
 0x11b   :  { %v3056_v19 = vld [vmem:[%s4319_s5 + $0xb0] ss:$28 sps:$4 sm:$0xff]  }
 0x11c   :  { %v3059_v20 = vld [vmem:[%s4319_s5 + $0x430] ss:$28 sps:$4 sm:$0xff]  }
 0x11d   :  { %2147 = vmatpush2.bf16.msra.mxu1 %v3008_v23  ;;  %2188 = vmatpush2.bf16.msra.mxu0 %v3011_v25  ;;  %v3064_v23 = vld [vmem:[%s4319_s5 + $0x7c] ss:$28 sps:$4 sm:$0xff]  }
 0x11e   :  { %2148 = vmatprep.subr.bf16.mxu1 %v3016_v26  ;;  %2189 = vmatprep.subr.bf16.mxu0 %v3019_v27  ;;  %v3067_v25 = vld [vmem:[%s4319_s5 + $0x3fc] ss:$28 sps:$4 sm:$0xff]  }
 0x11f   :  { %v3062_v26 = vld [vmem:[%s4319_s5 + $0x78] ss:$28 sps:$4 sm:$0xff]  }
 0x120   :  { %v3065_v27 = vld [vmem:[%s4319_s5 + $0x3f8] ss:$28 sps:$4 sm:$0xff]  }
 0x121   :  { %2149 = vmatpush2.bf16.msra.mxu1 %v3014_v28  ;;  %2190 = vmatpush2.bf16.msra.mxu0 %v3017_v29  ;;  %v3070_v28 = vld [vmem:[%s4319_s5 + $0x44] ss:$28 sps:$4 sm:$0xff]  }
 0x122   :  { %2150 = vmatprep.subr.bf16.mxu1 %v3022_v30  ;;  %2191 = vmatprep.subr.bf16.mxu0 %v3025_v31  ;;  %v3073_v29 = vld [vmem:[%s4319_s5 + $0x3c4] ss:$28 sps:$4 sm:$0xff]  }
 0x123   :  { %v3068_v30 = vld [vmem:[%s4319_s5 + $0x40] ss:$28 sps:$4 sm:$0xff]  }
 0x124   :  { %v3071_v31 = vld [vmem:[%s4319_s5 + $0x3c0] ss:$28 sps:$4 sm:$0xff]  }
 0x125   :  { %2151 = vmatpush2.bf16.msra.mxu1 %v3020_v32  ;;  %2192 = vmatpush2.bf16.msra.mxu0 %v3023_v33  ;;  %v3076_v32 = vld [vmem:[%s4319_s5 + $0xc] ss:$28 sps:$4 sm:$0xff]  }
 0x126   :  { %2152 = vmatprep.subr.bf16.mxu1 %v3028_v34  ;;  %2193 = vmatprep.subr.bf16.mxu0 %v3031_v35  ;;  %v3079_v33 = vld [vmem:[%s4319_s5 + $0x38c] ss:$28 sps:$4 sm:$0xff]  }
 0x127   :  { %v3074_v34 = vld [vmem:[%s4319_s5 + $0x8] ss:$28 sps:$4 sm:$0xff]  }
 0x128   :  { %v3077_v35 = vld [vmem:[%s4319_s5 + $0x388] ss:$28 sps:$4 sm:$0xff]  }
 0x129   :  { %2153 = vmatpush2.bf16.msra.mxu1 %v3026_v36  ;;  %2194 = vmatpush2.bf16.msra.mxu0 %v3029_v37  ;;  %v3082_v36 = vld [vmem:[%s4319_s5 + $0x354] ss:$28 sps:$4 sm:$0xff]  }
 0x12a   :  { %2204 = vmatprep.subr.bf16.mxu1 %v3034_v38  ;;  %2245 = vmatprep.subr.bf16.mxu0 %v3037_v39  ;;  %v3085_v37 = vld [vmem:[%s4319_s5 + $0x6d4] ss:$28 sps:$4 sm:$0xff]  }
 0x12b   :  { %v3080_v38 = vld [vmem:[%s4319_s5 + $0x350] ss:$28 sps:$4 sm:$0xff]  }
 0x12c   :  { %v3083_v39 = vld [vmem:[%s4319_s5 + $0x6d0] ss:$28 sps:$4 sm:$0xff]  }
 0x1ac   :  { %v621_v47 = vpop.f32.mrf.mxu1  ;;  %v662_v48 = vpop.f32.mrf.mxu0 }
 0x1ad   :  { %v622_v49 = vadd.f32 %v621_v47, %v250_v43  ;;  %v663_v50 = vadd.f32 %v662_v48, %v258_v44  ;;  %v3091_v43 = vld [vmem:[%s4319_s5 + $0x69c] ss:$28 sps:$4 sm:$0xff]   ;;  %v3097_v47 = vld [vmem:[%s4319_s5 + $0x664] ss:$28 sps:$4 sm:$0xff]  }
 0x1ae   :  { %v623_v51 = vpop.f32.mrf.mxu1  ;;  %v664_v52 = vpop.f32.mrf.mxu0  ;;  %v3086_v44 = vld [vmem:[%s4319_s5 + $0x318] ss:$28 sps:$4 sm:$0xff]   ;;  %v3092_v48 = vld [vmem:[%s4319_s5 + $0x2e0] ss:$28 sps:$4 sm:$0xff]  }
 0x1af   :  { %v624_v53 = vadd.f32 %v623_v51, %v254_v45  ;;  %v665_v54 = vadd.f32 %v664_v52, %v262_v46  ;;  %v669_v55 = vmax.f32 %v622_v49, 0.0  ;;  %v671_v56 = vmax.f32 %v663_v50, 0.0  ;;  %v3089_v45 = vld [vmem:[%s4319_s5 + $0x698] ss:$28 sps:$4 sm:$0xff]   ;;  %v3094_v46 = vld [vmem:[%s4319_s5 + $0x2e4] ss:$28 sps:$4 sm:$0xff]  }
 0x1b0   :  { %v625_v57 = vpop.f32.mrf.mxu1  ;;  %v666_v58 = vpop.f32.mrf.mxu0  ;;  %v3095_v49 = vld [vmem:[%s4319_s5 + $0x660] ss:$28 sps:$4 sm:$0xff]   ;;  %v3100_v50 = vld [vmem:[%s4319_s5 + $0x2ac] ss:$28 sps:$4 sm:$0xff]  }
 0x1b1   :  { %v670_v59 = vmax.f32 %v624_v53, 0.0  ;;  %v672_v60 = vmax.f32 %v665_v54, 0.0  ;;  %v3786_v3 = vpack.c.bf16 %v669_v55, %v669_v55  ;;  %v3788_v4 = vpack.c.bf16 %v671_v56, %v671_v56  ;;  %v3103_v51 = vld [vmem:[%s4319_s5 + $0x62c] ss:$28 sps:$4 sm:$0xff]   ;;  %v3106_v54 = vld [vmem:[%s4319_s5 + $0x274] ss:$28 sps:$4 sm:$0xff]  }
 0x1b2   :  { %v626_v61 = vpop.f32.mrf.mxu1  ;;  %v667_v62 = vpop.f32.mrf.mxu0  ;;  %v3098_v52 = vld [vmem:[%s4319_s5 + $0x2a8] ss:$28 sps:$4 sm:$0xff]   ;;  %v3109_v55 = vld [vmem:[%s4319_s5 + $0x5f4] ss:$28 sps:$4 sm:$0xff]   ;;  %v3112_v58 = vld [vmem:[%s4319_s5 + $0x23c] ss:$28 sps:$4 sm:$0xff]  }
 0x1b3   :  { %v3776_v63 = vpack.c.bf16 %v670_v59, %v670_v59  ;;  %v3778_v0 = vpack.c.bf16 %v672_v60, %v672_v60  ;;  %v3101_v53 = vld [vmem:[%s4319_s5 + $0x628] ss:$28 sps:$4 sm:$0xff]   ;;  %v3104_v56 = vld [vmem:[%s4319_s5 + $0x270] ss:$28 sps:$4 sm:$0xff]   ;;  %v3115_v59 = vld [vmem:[%s4319_s5 + $0x5bc] ss:$28 sps:$4 sm:$0xff]  }
 0x1b4   :  { %v3107_v57 = vld [vmem:[%s4319_s5 + $0x5f0] ss:$28 sps:$4 sm:$0xff]   ;;  %v3110_v60 = vld [vmem:[%s4319_s5 + $0x238] ss:$28 sps:$4 sm:$0xff]   ;;  %v3118_v62 = vld [vmem:[%s4319_s5 + $0x204] ss:$28 sps:$4 sm:$0xff]  }
 0x1b5   :  { %2154 = vmatprep.mubr.bf16.mxu1 %v3776_v63  ;;  %2195 = vmatprep.mubr.bf16.mxu0 %v3778_v0  ;;  %v3113_v61 = vld [vmem:[%s4319_s5 + $0x5b8] ss:$28 sps:$4 sm:$0xff]  }
 0x1b6   :  { %2155 = vmatmul.mubr.bf16.vlgmr.msra.gmra.mxu1 %v3786_v3  ;;  %2196 = vmatmul.mubr.bf16.vlgmr.msra.gmra.mxu0 %v3788_v4 }
 0x1b7   :  { %2205 = vmatpush1.bf16.msra.mxu1 %v3032_v1  ;;  %2246 = vmatpush1.bf16.msra.mxu0 %v3035_v2  ;;  %v3121_v1 = vld [vmem:[%s4319_s5 + $0x584] ss:$28 sps:$4 sm:$0xff]  }
 0x1b8   :  { %2236 = vmatprep.mubr.bf16.mxu1 %v3776_v63  ;;  %2277 = vmatprep.mubr.bf16.mxu0 %v3778_v0  ;;  %v3116_v2 = vld [vmem:[%s4319_s5 + $0x200] ss:$28 sps:$4 sm:$0xff]  }
 0x1b9   :  { %2206 = vmatprep.subr.bf16.mxu1 %v3040_v5  ;;  %2247 = vmatprep.subr.bf16.mxu0 %v3043_v6  ;;  %v3119_v5 = vld [vmem:[%s4319_s5 + $0x580] ss:$28 sps:$4 sm:$0xff]   ;;  %v3124_v6 = vld [vmem:[%s4319_s5 + $0x1cc] ss:$28 sps:$4 sm:$0xff]  }
 0x1bb   :  { %2207 = vmatpush1.bf16.msra.mxu1 %v3038_v7  ;;  %2248 = vmatpush1.bf16.msra.mxu0 %v3041_v8  ;;  %v3127_v7 = vld [vmem:[%s4319_s5 + $0x54c] ss:$28 sps:$4 sm:$0xff]  }
 0x1bc   :  { %2208 = vmatprep.subr.bf16.mxu1 %v3046_v9  ;;  %2249 = vmatprep.subr.bf16.mxu0 %v3049_v10  ;;  %v3122_v8 = vld [vmem:[%s4319_s5 + $0x1c8] ss:$28 sps:$4 sm:$0xff]   ;;  %v3130_v10 = vld [vmem:[%s4319_s5 + $0x19c] ss:$28 sps:$4 sm:$0xff]  }
 0x1bd   :  { %v3125_v9 = vld [vmem:[%s4319_s5 + $0x548] ss:$28 sps:$4 sm:$0xff]  }
 0x1bf   :  { %2209 = vmatpush1.bf16.msra.mxu1 %v3044_v11  ;;  %2250 = vmatpush1.bf16.msra.mxu0 %v3047_v12  ;;  %v3133_v11 = vld [vmem:[%s4319_s5 + $0x51c] ss:$28 sps:$4 sm:$0xff]  }
 0x1c0   :  { %2210 = vmatprep.subr.bf16.mxu1 %v3052_v13  ;;  %2251 = vmatprep.subr.bf16.mxu0 %v3055_v14  ;;  %v3128_v12 = vld [vmem:[%s4319_s5 + $0x198] ss:$28 sps:$4 sm:$0xff]   ;;  %v3136_v14 = vld [vmem:[%s4319_s5 + $0x164] ss:$28 sps:$4 sm:$0xff]  }
 0x1c1   :  { %v3131_v13 = vld [vmem:[%s4319_s5 + $0x518] ss:$28 sps:$4 sm:$0xff]  }
 0x1c3   :  { %2211 = vmatpush1.bf16.msra.mxu1 %v3050_v15  ;;  %2252 = vmatpush1.bf16.msra.mxu0 %v3053_v16  ;;  %v3139_v15 = vld [vmem:[%s4319_s5 + $0x4e4] ss:$28 sps:$4 sm:$0xff]  }
 0x1c4   :  { %2212 = vmatprep.subr.bf16.mxu1 %v3058_v17  ;;  %2253 = vmatprep.subr.bf16.mxu0 %v3061_v18  ;;  %v3134_v16 = vld [vmem:[%s4319_s5 + $0x160] ss:$28 sps:$4 sm:$0xff]   ;;  %v3142_v18 = vld [vmem:[%s4319_s5 + $0x12c] ss:$28 sps:$4 sm:$0xff]  }
 0x1c5   :  { %v3137_v17 = vld [vmem:[%s4319_s5 + $0x4e0] ss:$28 sps:$4 sm:$0xff]  }
 0x1c7   :  { %2213 = vmatpush1.bf16.msra.mxu1 %v3056_v19  ;;  %2254 = vmatpush1.bf16.msra.mxu0 %v3059_v20  ;;  %v3145_v19 = vld [vmem:[%s4319_s5 + $0x4ac] ss:$28 sps:$4 sm:$0xff]  }
 0x1c8   :  { %2214 = vmatprep.subr.bf16.mxu1 %v3064_v23  ;;  %2255 = vmatprep.subr.bf16.mxu0 %v3067_v25  ;;  %v3140_v20 = vld [vmem:[%s4319_s5 + $0x128] ss:$28 sps:$4 sm:$0xff]   ;;  %v3148_v25 = vld [vmem:[%s4319_s5 + $0xf4] ss:$28 sps:$4 sm:$0xff]  }
 0x1c9   :  { %v3143_v23 = vld [vmem:[%s4319_s5 + $0x4a8] ss:$28 sps:$4 sm:$0xff]  }
 0x1cb   :  { %2215 = vmatpush1.bf16.msra.mxu1 %v3062_v26  ;;  %2256 = vmatpush1.bf16.msra.mxu0 %v3065_v27  ;;  %v3151_v26 = vld [vmem:[%s4319_s5 + $0x474] ss:$28 sps:$4 sm:$0xff]  }
 0x1cc   :  { %2216 = vmatprep.subr.bf16.mxu1 %v3070_v28  ;;  %2257 = vmatprep.subr.bf16.mxu0 %v3073_v29  ;;  %v3146_v27 = vld [vmem:[%s4319_s5 + $0xf0] ss:$28 sps:$4 sm:$0xff]   ;;  %v3154_v29 = vld [vmem:[%s4319_s5 + $0xbc] ss:$28 sps:$4 sm:$0xff]  }
 0x1cd   :  { %v3149_v28 = vld [vmem:[%s4319_s5 + $0x470] ss:$28 sps:$4 sm:$0xff]  }
 0x1cf   :  { %2217 = vmatpush1.bf16.msra.mxu1 %v3068_v30  ;;  %2258 = vmatpush1.bf16.msra.mxu0 %v3071_v31  ;;  %v3157_v30 = vld [vmem:[%s4319_s5 + $0x43c] ss:$28 sps:$4 sm:$0xff]  }
 0x1d0   :  { %2218 = vmatprep.subr.bf16.mxu1 %v3076_v32  ;;  %2259 = vmatprep.subr.bf16.mxu0 %v3079_v33  ;;  %v3152_v31 = vld [vmem:[%s4319_s5 + $0xb8] ss:$28 sps:$4 sm:$0xff]   ;;  %v3160_v33 = vld [vmem:[%s4319_s5 + $0x84] ss:$28 sps:$4 sm:$0xff]  }
 0x1d1   :  { %v3155_v32 = vld [vmem:[%s4319_s5 + $0x438] ss:$28 sps:$4 sm:$0xff]  }
 0x1d3   :  { %2219 = vmatpush1.bf16.msra.mxu1 %v3074_v34  ;;  %2260 = vmatpush1.bf16.msra.mxu0 %v3077_v35  ;;  %v3163_v34 = vld [vmem:[%s4319_s5 + $0x404] ss:$28 sps:$4 sm:$0xff]  }
 0x1d4   :  { %2220 = vmatprep.subr.bf16.mxu1 %v3082_v36  ;;  %2261 = vmatprep.subr.bf16.mxu0 %v3085_v37  ;;  %v3158_v35 = vld [vmem:[%s4319_s5 + $0x80] ss:$28 sps:$4 sm:$0xff]   ;;  %v3166_v37 = vld [vmem:[%s4319_s5 + $0x4c] ss:$28 sps:$4 sm:$0xff]  }
 0x1d5   :  { %v3161_v36 = vld [vmem:[%s4319_s5 + $0x400] ss:$28 sps:$4 sm:$0xff]  }
 0x1d7   :  { %2221 = vmatpush2.bf16.msra.mxu1 %v3080_v38  ;;  %2262 = vmatpush2.bf16.msra.mxu0 %v3083_v39  ;;  %v3169_v38 = vld [vmem:[%s4319_s5 + $0x3cc] ss:$28 sps:$4 sm:$0xff]  }
 0x1d8   :  { %2222 = vmatprep.subr.bf16.mxu1 %v3088_v41  ;;  %2263 = vmatprep.subr.bf16.mxu0 %v3091_v43  ;;  %v3164_v39 = vld [vmem:[%s4319_s5 + $0x48] ss:$28 sps:$4 sm:$0xff]   ;;  %v3172_v43 = vld [vmem:[%s4319_s5 + $0x14] ss:$28 sps:$4 sm:$0xff]  }
 0x1d9   :  { %v3167_v41 = vld [vmem:[%s4319_s5 + $0x3c8] ss:$28 sps:$4 sm:$0xff]  }
 0x1db   :  { %2223 = vmatpush2.bf16.msra.mxu1 %v3086_v44  ;;  %2264 = vmatpush2.bf16.msra.mxu0 %v3089_v45  ;;  %v3175_v44 = vld [vmem:[%s4319_s5 + $0x394] ss:$28 sps:$4 sm:$0xff]  }
 0x1dc   :  { %2224 = vmatprep.subr.bf16.mxu1 %v3094_v46  ;;  %2265 = vmatprep.subr.bf16.mxu0 %v3097_v47  ;;  %v3170_v45 = vld [vmem:[%s4319_s5 + $0x10] ss:$28 sps:$4 sm:$0xff]   ;;  %v3178_v47 = vld [vmem:[%s4319_s5 + $0x35c] ss:$28 sps:$4 sm:$0xff]  }
 0x1dd   :  { %v3173_v46 = vld [vmem:[%s4319_s5 + $0x390] ss:$28 sps:$4 sm:$0xff]  }
 0x1df   :  { %2225 = vmatpush2.bf16.msra.mxu1 %v3092_v48  ;;  %2266 = vmatpush2.bf16.msra.mxu0 %v3095_v49  ;;  %v3181_v48 = vld [vmem:[%s4319_s5 + $0x6dc] ss:$28 sps:$4 sm:$0xff]  }
 0x1e0   :  { %2226 = vmatprep.subr.bf16.mxu1 %v3100_v50  ;;  %2267 = vmatprep.subr.bf16.mxu0 %v3103_v51  ;;  %v3176_v49 = vld [vmem:[%s4319_s5 + $0x358] ss:$28 sps:$4 sm:$0xff]   ;;  %v3184_v51 = vld [vmem:[%s4319_s5 + $0x324] ss:$28 sps:$4 sm:$0xff]  }
 0x1e1   :  { %v3179_v50 = vld [vmem:[%s4319_s5 + $0x6d8] ss:$28 sps:$4 sm:$0xff]  }
 0x1e3   :  { %2227 = vmatpush2.bf16.msra.mxu1 %v3098_v52  ;;  %2268 = vmatpush2.bf16.msra.mxu0 %v3101_v53  ;;  %v3187_v52 = vld [vmem:[%s4319_s5 + $0x6a4] ss:$28 sps:$4 sm:$0xff]  }
 0x1e4   :  { %2228 = vmatprep.subr.bf16.mxu1 %v3106_v54  ;;  %2269 = vmatprep.subr.bf16.mxu0 %v3109_v55  ;;  %v3182_v53 = vld [vmem:[%s4319_s5 + $0x320] ss:$28 sps:$4 sm:$0xff]   ;;  %v3190_v55 = vld [vmem:[%s4319_s5 + $0x2ec] ss:$28 sps:$4 sm:$0xff]  }
 0x1e5   :  { %v3185_v54 = vld [vmem:[%s4319_s5 + $0x6a0] ss:$28 sps:$4 sm:$0xff]  }
 0x1e7   :  { %2229 = vmatpush2.bf16.msra.mxu1 %v3104_v56  ;;  %2270 = vmatpush2.bf16.msra.mxu0 %v3107_v57  ;;  %v3193_v56 = vld [vmem:[%s4319_s5 + $0x66c] ss:$28 sps:$4 sm:$0xff]  }
 0x1e8   :  { %2230 = vmatprep.subr.bf16.mxu1 %v3112_v58  ;;  %2271 = vmatprep.subr.bf16.mxu0 %v3115_v59  ;;  %v3188_v57 = vld [vmem:[%s4319_s5 + $0x2e8] ss:$28 sps:$4 sm:$0xff]   ;;  %v3196_v59 = vld [vmem:[%s4319_s5 + $0x2b4] ss:$28 sps:$4 sm:$0xff]  }
 0x1e9   :  { %v3191_v58 = vld [vmem:[%s4319_s5 + $0x668] ss:$28 sps:$4 sm:$0xff]  }
 0x1eb   :  { %2231 = vmatpush2.bf16.msra.mxu1 %v3110_v60  ;;  %2272 = vmatpush2.bf16.msra.mxu0 %v3113_v61  ;;  %v3199_v60 = vld [vmem:[%s4319_s5 + $0x634] ss:$28 sps:$4 sm:$0xff]  }
 0x1ec   :  { %2232 = vmatprep.subr.bf16.mxu1 %v3118_v62  ;;  %2273 = vmatprep.subr.bf16.mxu0 %v3121_v1  ;;  %v3194_v61 = vld [vmem:[%s4319_s5 + $0x2b0] ss:$28 sps:$4 sm:$0xff]   ;;  %v3202_v1 = vld [vmem:[%s4319_s5 + $0x27c] ss:$28 sps:$4 sm:$0xff]  }
 0x1ed   :  { %v3197_v62 = vld [vmem:[%s4319_s5 + $0x630] ss:$28 sps:$4 sm:$0xff]  }
 0x1ef   :  { %2233 = vmatpush2.bf16.msra.mxu1 %v3116_v2  ;;  %2274 = vmatpush2.bf16.msra.mxu0 %v3119_v5  ;;  %v3205_v2 = vld [vmem:[%s4319_s5 + $0x5fc] ss:$28 sps:$4 sm:$0xff]  }
 0x1f0   :  { %2234 = vmatprep.subr.bf16.mxu1 %v3124_v6  ;;  %2275 = vmatprep.subr.bf16.mxu0 %v3127_v7  ;;  %v3200_v5 = vld [vmem:[%s4319_s5 + $0x278] ss:$28 sps:$4 sm:$0xff]   ;;  %v3208_v7 = vld [vmem:[%s4319_s5 + $0x244] ss:$28 sps:$4 sm:$0xff]  }
 0x1f1   :  { %v3203_v6 = vld [vmem:[%s4319_s5 + $0x5f8] ss:$28 sps:$4 sm:$0xff]  }
 0x1f3   :  { %2235 = vmatpush2.bf16.msra.mxu1 %v3122_v8  ;;  %2276 = vmatpush2.bf16.msra.mxu0 %v3125_v9  ;;  %v3211_v8 = vld [vmem:[%s4319_s5 + $0x5c4] ss:$28 sps:$4 sm:$0xff]  }
 0x1f4   :  { %2286 = vmatprep.subr.bf16.mxu1 %v3130_v10  ;;  %2327 = vmatprep.subr.bf16.mxu0 %v3133_v11  ;;  %v3206_v9 = vld [vmem:[%s4319_s5 + $0x240] ss:$28 sps:$4 sm:$0xff]   ;;  %v3214_v11 = vld [vmem:[%s4319_s5 + $0x20c] ss:$28 sps:$4 sm:$0xff]  }
 0x1f5   :  { %v3209_v10 = vld [vmem:[%s4319_s5 + $0x5c0] ss:$28 sps:$4 sm:$0xff]  }
 0x1f6   :  { %2237 = vmatmul.mubr.bf16.vlgmr.msra.gmra.mxu1 %v3786_v3  ;;  %2278 = vmatmul.mubr.bf16.vlgmr.msra.gmra.mxu0 %v3788_v4 }
 0x1f7   :  { %2287 = vmatpush1.bf16.msra.mxu1 %v3128_v12  ;;  %2318 = vmatprep.mubr.bf16.mxu1 %v3776_v63  ;;  %v3217_v12 = vld [vmem:[%s4319_s5 + $0x58c] ss:$28 sps:$4 sm:$0xff]  }
 0x1f8   :  { %2328 = vmatpush1.bf16.msra.mxu0 %v3131_v13  ;;  %2359 = vmatprep.mubr.bf16.mxu0 %v3778_v0  ;;  %v3212_v13 = vld [vmem:[%s4319_s5 + $0x208] ss:$28 sps:$4 sm:$0xff]  }
 0x1f9   :  { %2288 = vmatprep.subr.bf16.mxu1 %v3136_v14  ;;  %2329 = vmatprep.subr.bf16.mxu0 %v3139_v15  ;;  %v3215_v14 = vld [vmem:[%s4319_s5 + $0x588] ss:$28 sps:$4 sm:$0xff]   ;;  %v3220_v15 = vld [vmem:[%s4319_s5 + $0x1d4] ss:$28 sps:$4 sm:$0xff]  }
 0x1fb   :  { %2289 = vmatpush1.bf16.msra.mxu1 %v3134_v16  ;;  %v3223_v16 = vld [vmem:[%s4319_s5 + $0x554] ss:$28 sps:$4 sm:$0xff]  }
 0x1fc   :  { %2330 = vmatpush1.bf16.msra.mxu0 %v3137_v17  ;;  %2290 = vmatprep.subr.bf16.mxu1 %v3142_v18  ;;  %v3218_v17 = vld [vmem:[%s4319_s5 + $0x1d0] ss:$28 sps:$4 sm:$0xff]  }
 0x1fd   :  { %2331 = vmatprep.subr.bf16.mxu0 %v3145_v19  ;;  %v3221_v18 = vld [vmem:[%s4319_s5 + $0x550] ss:$28 sps:$4 sm:$0xff]   ;;  %v3224_v19 = vld [vmem:[%s4319_s5 + $0x360] ss:$28 sps:$4 sm:$0xff]  }
 0x1ff   :  { %2291 = vmatpush1.bf16.msra.mxu1 %v3140_v20  ;;  %v3225_v20 = vld [vmem:[%s4319_s5 + $0x6e0] ss:$28 sps:$4 sm:$0xff]  }
 0x200   :  { %2332 = vmatpush1.bf16.msra.mxu0 %v3143_v23  ;;  %2292 = vmatprep.subr.bf16.mxu1 %v3148_v25  ;;  %v3226_v23 = vld [vmem:[%s4319_s5 + $0x1a0] ss:$28 sps:$4 sm:$0xff]  }
 0x201   :  { %2333 = vmatprep.subr.bf16.mxu0 %v3151_v26  ;;  %v3227_v25 = vld [vmem:[%s4319_s5 + $0x520] ss:$28 sps:$4 sm:$0xff]   ;;  %v3228_v26 = vld [vmem:[%s4319_s5 + $0x328] ss:$28 sps:$4 sm:$0xff]  }
 0x203   :  { %2293 = vmatpush1.bf16.msra.mxu1 %v3146_v27  ;;  %v3229_v27 = vld [vmem:[%s4319_s5 + $0x6a8] ss:$28 sps:$4 sm:$0xff]  }
 0x204   :  { %2334 = vmatpush1.bf16.msra.mxu0 %v3149_v28  ;;  %2294 = vmatprep.subr.bf16.mxu1 %v3154_v29  ;;  %v3230_v28 = vld [vmem:[%s4319_s5 + $0x168] ss:$28 sps:$4 sm:$0xff]  }
 0x205   :  { %2335 = vmatprep.subr.bf16.mxu0 %v3157_v30  ;;  %v3231_v29 = vld [vmem:[%s4319_s5 + $0x4e8] ss:$28 sps:$4 sm:$0xff]   ;;  %v3232_v30 = vld [vmem:[%s4319_s5 + $0x2f0] ss:$28 sps:$4 sm:$0xff]  }
 0x207   :  { %2295 = vmatpush1.bf16.msra.mxu1 %v3152_v31  ;;  %v3233_v31 = vld [vmem:[%s4319_s5 + $0x670] ss:$28 sps:$4 sm:$0xff]  }
 0x208   :  { %2336 = vmatpush1.bf16.msra.mxu0 %v3155_v32  ;;  %2296 = vmatprep.subr.bf16.mxu1 %v3160_v33  ;;  %v3235_v32 = vld [vmem:[%s4319_s5 + $0x4b0] ss:$28 sps:$4 sm:$0xff]   ;;  %v3237_v33 = vld [vmem:[%s4319_s5 + $0x638] ss:$28 sps:$4 sm:$0xff]  }
 0x209   :  { %2337 = vmatprep.subr.bf16.mxu0 %v3163_v34  ;;  %v3238_v34 = vld [vmem:[%s4319_s5 + $0xf8] ss:$28 sps:$4 sm:$0xff]  }
 0x20b   :  { %2297 = vmatpush1.bf16.msra.mxu1 %v3158_v35  ;;  %v3239_v35 = vld [vmem:[%s4319_s5 + $0x478] ss:$28 sps:$4 sm:$0xff]  }
 0x20c   :  { %2338 = vmatpush1.bf16.msra.mxu0 %v3161_v36  ;;  %2298 = vmatprep.subr.bf16.mxu1 %v3166_v37  ;;  %v3240_v36 = vld [vmem:[%s4319_s5 + $0x280] ss:$28 sps:$4 sm:$0xff]  }
 0x20d   :  { %2339 = vmatprep.subr.bf16.mxu0 %v3169_v38  ;;  %v3241_v37 = vld [vmem:[%s4319_s5 + $0x600] ss:$28 sps:$4 sm:$0xff]  }
 0x20e   :  { %v3242_v38 = vld [vmem:[%s4319_s5 + $0xc0] ss:$28 sps:$4 sm:$0xff]  }
 0x20f   :  { %2299 = vmatpush1.bf16.msra.mxu1 %v3164_v39  ;;  %v3243_v39 = vld [vmem:[%s4319_s5 + $0x440] ss:$28 sps:$4 sm:$0xff]  }
 0x210   :  { %2340 = vmatpush1.bf16.msra.mxu0 %v3167_v41  ;;  %2300 = vmatprep.subr.bf16.mxu1 %v3172_v43  ;;  %v3244_v41 = vld [vmem:[%s4319_s5 + $0x248] ss:$28 sps:$4 sm:$0xff]  }
 0x211   :  { %2341 = vmatprep.subr.bf16.mxu0 %v3175_v44  ;;  %v3245_v43 = vld [vmem:[%s4319_s5 + $0x5c8] ss:$28 sps:$4 sm:$0xff]  }
 0x212   :  { %v3246_v44 = vld [vmem:[%s4319_s5 + $0x88] ss:$28 sps:$4 sm:$0xff]  }
 0x213   :  { %2301 = vmatpush1.bf16.msra.mxu1 %v3170_v45  ;;  %v3247_v45 = vld [vmem:[%s4319_s5 + $0x408] ss:$28 sps:$4 sm:$0xff]  }
 0x214   :  { %2342 = vmatpush1.bf16.msra.mxu0 %v3173_v46  ;;  %2302 = vmatprep.subr.bf16.mxu1 %v3178_v47  ;;  %v3248_v46 = vld [vmem:[%s4319_s5 + $0x210] ss:$28 sps:$4 sm:$0xff]  }
 0x215   :  { %2343 = vmatprep.subr.bf16.mxu0 %v3181_v48  ;;  %v3249_v47 = vld [vmem:[%s4319_s5 + $0x590] ss:$28 sps:$4 sm:$0xff]  }
 0x216   :  { %v3250_v48 = vld [vmem:[%s4319_s5 + $0x50] ss:$28 sps:$4 sm:$0xff]  }
 0x217   :  { %2303 = vmatpush2.bf16.msra.mxu1 %v3176_v49  ;;  %v3251_v49 = vld [vmem:[%s4319_s5 + $0x3d0] ss:$28 sps:$4 sm:$0xff]  }
 0x218   :  { %2344 = vmatpush2.bf16.msra.mxu0 %v3179_v50  ;;  %2304 = vmatprep.subr.bf16.mxu1 %v3184_v51  ;;  %v3252_v50 = vld [vmem:[%s4319_s5 + $0x1d8] ss:$28 sps:$4 sm:$0xff]  }
 0x219   :  { %2345 = vmatprep.subr.bf16.mxu0 %v3187_v52  ;;  %v3253_v51 = vld [vmem:[%s4319_s5 + $0x558] ss:$28 sps:$4 sm:$0xff]  }
 0x21a   :  { %v3254_v52 = vld [vmem:[%s4319_s5 + $0x18] ss:$28 sps:$4 sm:$0xff]  }
 0x21b   :  { %2305 = vmatpush2.bf16.msra.mxu1 %v3182_v53  ;;  %v3255_v53 = vld [vmem:[%s4319_s5 + $0x398] ss:$28 sps:$4 sm:$0xff]  }
 0x21c   :  { %2346 = vmatpush2.bf16.msra.mxu0 %v3185_v54  ;;  %2306 = vmatprep.subr.bf16.mxu1 %v3190_v55  ;;  %v4277_v54 = vld [vmem:[%s4322_s6] sm:$0x7f] }
 0x21d   :  { %2347 = vmatprep.subr.bf16.mxu0 %v3193_v56  ;;  %v938_v55 = vrot.slane %v4277_v54, %v3563_v22  ;;  %v942_v56 = vrot.slane %v4277_v54, %v3569_v24  ;;  %v946_v24 = vrot.slane %v4277_v54, %v257_v40 }
 0x21f   :  { %2307 = vmatpush2.bf16.msra.mxu1 %v3188_v57 }
 0x220   :  { %2348 = vmatpush2.bf16.msra.mxu0 %v3191_v58  ;;  %2308 = vmatprep.subr.bf16.mxu1 %v3196_v59 }
 0x221   :  { %2349 = vmatprep.subr.bf16.mxu0 %v3199_v60 }
 0x223   :  { %2309 = vmatpush2.bf16.msra.mxu1 %v3194_v61 }
 0x224   :  { %2350 = vmatpush2.bf16.msra.mxu0 %v3197_v62  ;;  %2310 = vmatprep.subr.bf16.mxu1 %v3202_v1 }
 0x225   :  { %2351 = vmatprep.subr.bf16.mxu0 %v3205_v2 }
 0x227   :  { %2311 = vmatpush2.bf16.msra.mxu1 %v3200_v5 }
 0x228   :  { %2352 = vmatpush2.bf16.msra.mxu0 %v3203_v6  ;;  %2312 = vmatprep.subr.bf16.mxu1 %v3208_v7 }
 0x229   :  { %2353 = vmatprep.subr.bf16.mxu0 %v3211_v8  ;;  %v950_v8 = vrot.slane %v4277_v54, %v261_v42  ;;  %v953_v42 = vsub.s32 4, %v3560_v21 }
 0x22b   :  { %2313 = vmatpush2.bf16.msra.mxu1 %v3206_v9 }
 0x22c   :  { %2354 = vmatpush2.bf16.msra.mxu0 %v3209_v10  ;;  %2314 = vmatprep.subr.bf16.mxu1 %v3214_v11 }
 0x22d   :  { %2355 = vmatprep.subr.bf16.mxu0 %v3217_v12 }
 0x22f   :  { %2315 = vmatpush2.bf16.msra.mxu1 %v3212_v13 }
 0x230   :  { %2356 = vmatpush2.bf16.msra.mxu0 %v3215_v14  ;;  %2316 = vmatprep.subr.bf16.mxu1 %v3220_v15 }
 0x231   :  { %2357 = vmatprep.subr.bf16.mxu0 %v3223_v16 }
 0x233   :  { %2317 = vmatpush2.bf16.msra.mxu1 %v3218_v17 }
 0x234   :  { %2358 = vmatpush2.bf16.msra.mxu0 %v3221_v18  ;;  %2771 = vmatprep.subr.bf16.mxu1 %v3224_v19 }
 0x235   :  { %2793 = vmatprep.subr.bf16.mxu0 %v3225_v20 }
 0x236   :  { %2319 = vmatmul.mubr.bf16.vlgmr.msra.gmra.mxu1 %v3786_v3 }
 0x237   :  { %2360 = vmatmul.mubr.bf16.vlgmr.msra.gmra.mxu0 %v3788_v4  ;;  %2772 = vmatpush3.bf16.msra.mxu1 %v3226_v23 }
 0x238   :  { %2400 = vmatprep.mubr.bf16.mxu1 %v3776_v63  ;;  %2794 = vmatpush3.bf16.msra.mxu0 %v3227_v25  ;;  %v3234_v63 = vld [vmem:[%s4319_s5 + $0x130] ss:$28 sps:$4 sm:$0xff]   ;;  %v957_v25 = vsub.s32 5, %v3560_v21 }
 0x239   :  { %2440 = vmatprep.mubr.bf16.mxu0 %v3778_v0  ;;  %2773 = vmatprep.subr.bf16.mxu1 %v3228_v26  ;;  %v3236_v0 = vld [vmem:[%s4319_s5 + $0x2b8] ss:$28 sps:$4 sm:$0xff]   ;;  %v954_v26 = vrot.slane %v4277_v54, %v953_v42 }
 0x23a   :  { %2795 = vmatprep.subr.bf16.mxu0 %v3229_v27  ;;  %v958_v27 = vrot.slane %v4277_v54, %v957_v25 }
 0x23b   :  { %2774 = vmatpush3.bf16.msra.mxu1 %v3230_v28 }
 0x23c   :  { %2796 = vmatpush3.bf16.msra.mxu0 %v3231_v29  ;;  %2775 = vmatprep.subr.bf16.mxu1 %v3232_v30 }
 0x23d   :  { %2797 = vmatprep.subr.bf16.mxu0 %v3233_v31 }
 0x23f   :  { %2776 = vmatpush3.bf16.msra.mxu1 %v3234_v63 }
 0x240   :  { %2798 = vmatpush3.bf16.msra.mxu0 %v3235_v32  ;;  %2777 = vmatprep.subr.bf16.mxu1 %v3236_v0 }
 0x241   :  { %2799 = vmatprep.subr.bf16.mxu0 %v3237_v33 }
 0x243   :  { %2778 = vmatpush3.bf16.msra.mxu1 %v3238_v34 }
 0x244   :  { %2800 = vmatpush3.bf16.msra.mxu0 %v3239_v35  ;;  %2779 = vmatprep.subr.bf16.mxu1 %v3240_v36 }
 0x245   :  { %2801 = vmatprep.subr.bf16.mxu0 %v3241_v37 }
 0x247   :  { %2780 = vmatpush3.bf16.msra.mxu1 %v3242_v38 }
 0x248   :  { %2802 = vmatpush3.bf16.msra.mxu0 %v3243_v39  ;;  %2781 = vmatprep.subr.bf16.mxu1 %v3244_v41  ;;  %v961_v41 = vsub.s32 6, %v3560_v21 }
 0x249   :  { %2803 = vmatprep.subr.bf16.mxu0 %v3245_v43 }
 0x24b   :  { %2782 = vmatpush3.bf16.msra.mxu1 %v3246_v44 }
 0x24c   :  { %2804 = vmatpush3.bf16.msra.mxu0 %v3247_v45  ;;  %2783 = vmatprep.subr.bf16.mxu1 %v3248_v46  ;;  %v962_v45 = vrot.slane %v4277_v54, %v961_v41 }
 0x24d   :  { %2805 = vmatprep.subr.bf16.mxu0 %v3249_v47 }
 0x24f   :  { %2784 = vmatpush3.bf16.msra.mxu1 %v3250_v48 }
 0x250   :  { %2806 = vmatpush3.bf16.msra.mxu0 %v3251_v49  ;;  %2785 = vmatprep.subr.bf16.mxu1 %v3252_v50 }
 0x251   :  { %2807 = vmatprep.subr.bf16.mxu0 %v3253_v51 }
 0x253   :  { %2786 = vmatpush3.bf16.msra.mxu1 %v3254_v52 }
 0x254   :  { %2808 = vmatpush3.bf16.msra.mxu0 %v3255_v53 }
 0x256   :  { %2401 = vmatmul.mubr.bf16.vlgmr.msra.gmra.mxu1 %v3786_v3 }
 0x257   :  { %2441 = vmatmul.mubr.bf16.vlgmr.msra.gmra.mxu0 %v3788_v4 }
 0x276   :  { %v2156_v57 = vpop.f32.mrf.mxu1  ;;  %v2197_v58 = vpop.f32.mrf.mxu0 }
 0x277   :  { %v2157_v59 = vadd.f32 %v2156_v57, %v938_v55 }
 0x278   :  { %v2158_v60 = vpop.f32.mrf.mxu1  ;;  %v2199_v61 = vpop.f32.mrf.mxu0 }
 0x279   :  { %v2198_v62 = vadd.f32 %v2197_v58, %v2157_v59  ;;  %v2159_v3 = vadd.f32 %v2158_v60, %v942_v56 }
 0x27a   :  { %v2160_v1 = vpop.f32.mrf.mxu1  ;;  %v2201_v4 = vpop.f32.mrf.mxu0 }
 0x27b   :  { %3256 = vtanh.f32 %v2198_v62  ;;  %v2200_v2 = vadd.f32 %v2199_v61, %v2159_v3 }
 0x27c   :  { %v2161_v5 = vpop.f32.mrf.mxu1  ;;  %v2202_v6 = vpop.f32.mrf.mxu0 }
 0x27d   :  { %3258 = vtanh.f32 %v2200_v2 }
 0x288   :  { %v3257_v7 = vpop.eup %3256 }
 0x289   :  { %2455 = vst [vmem:[%s4323_s7] sm:$0xff] %v3257_v7 }
 0x28a   :  { %v3259_v22 = vpop.eup %3258 }
 0x28b   :  { %2456 = vst [vmem:[%s4323_s7 + $0x8] sm:$0xff] %v3259_v22 }
 0x2b6   :  { %v2238_v9 = vpop.f32.mrf.mxu1  ;;  %v2279_v10 = vpop.f32.mrf.mxu0 }
 0x2b7   :  { %v2239_v11 = vadd.f32 %v2238_v9, %v946_v24 }
 0x2b8   :  { %v2240_v12 = vpop.f32.mrf.mxu1  ;;  %v2281_v13 = vpop.f32.mrf.mxu0 }
 0x2b9   :  { %v2280_v14 = vadd.f32 %v2279_v10, %v2239_v11  ;;  %v2241_v15 = vadd.f32 %v2240_v12, %v950_v8 }
 0x2ba   :  { %v2242_v16 = vpop.f32.mrf.mxu1  ;;  %v2283_v17 = vpop.f32.mrf.mxu0 }
 0x2bb   :  { %3260 = vtanh.f32 %v2280_v14  ;;  %v2282_v18 = vadd.f32 %v2281_v13, %v2241_v15 }
 0x2bc   :  { %v2243_v19 = vpop.f32.mrf.mxu1  ;;  %v2284_v20 = vpop.f32.mrf.mxu0 }
 0x2bd   :  { %3262 = vtanh.f32 %v2282_v18 }
 0x2c8   :  { %v3261_v23 = vpop.eup %3260 }
 0x2c9   :  { %2457 = vst [vmem:[%s4323_s7 + $0x10] sm:$0xff] %v3261_v23 }
 0x2ca   :  { %v3263_v40 = vpop.eup %3262 }
 0x2cb   :  { %2458 = vst [vmem:[%s4323_s7 + $0x18] sm:$0xff] %v3263_v40 }
 0x2f6   :  { %v2320_v28 = vpop.f32.mrf.mxu1 }
 0x2f7   :  { %v2321_v29 = vadd.f32 %v2320_v28, %v954_v26  ;;  %v2361_v30 = vpop.f32.mrf.mxu0 }
 0x2f8   :  { %v2322_v31 = vpop.f32.mrf.mxu1 }
 0x2f9   :  { %v2362_v63 = vadd.f32 %v2361_v30, %v2321_v29  ;;  %v2323_v32 = vadd.f32 %v2322_v31, %v958_v27  ;;  %v2363_v0 = vpop.f32.mrf.mxu0 }
 0x2fa   :  { %v2324_v33 = vpop.f32.mrf.mxu1 }
 0x2fb   :  { %3264 = vtanh.f32 %v2362_v63  ;;  %v2364_v34 = vadd.f32 %v2363_v0, %v2323_v32  ;;  %v2365_v35 = vpop.f32.mrf.mxu0 }
 0x2fc   :  { %v2325_v36 = vpop.f32.mrf.mxu1 }
 0x2fd   :  { %3266 = vtanh.f32 %v2364_v34  ;;  %v2366_v37 = vpop.f32.mrf.mxu0 }
 0x308   :  { %v3265_v38 = vpop.eup %3264 }
 0x309   :  { %2459 = vst [vmem:[%s4323_s7 + $0x20] sm:$0xff] %v3265_v38 }
 0x30a   :  { %v3267_v39 = vpop.eup %3266 }
 0x30b   :  { %2460 = vst [vmem:[%s4323_s7 + $0x28] sm:$0xff] %v3267_v39 }
 0x316   :  { %v2787_v43 = vpop.f32.mrf.mxu1 }
 0x317   :  { %v2809_v44 = vpop.f32.mrf.mxu0 }
 0x318   :  { %v2788_v46 = vpop.f32.mrf.mxu1 }
 0x319   :  { %v2789_v47 = vadd.f32 %v2788_v46, %v2787_v43  ;;  %v2810_v48 = vpop.f32.mrf.mxu0 }
 0x31a   :  { %v2790_v49 = vpop.f32.mrf.mxu1  ;;  %v2811_v51 = vadd.f32 %v2810_v48, %v2809_v44 }
 0x31b   :  { %v2403_v50 = vadd.f32 %v2789_v47, %v962_v45  ;;  %v2812_v52 = vpop.f32.mrf.mxu0 }
 0x31c   :  { %v2791_v53 = vpop.f32.mrf.mxu1 }
 0x31d   :  { %v2443_v55 = vadd.f32 %v2811_v51, %v2403_v50  ;;  %v2813_v56 = vpop.f32.mrf.mxu0 }
 0x31f   :  { %3268 = vtanh.f32 %v2443_v55 }
 0x32c   :  { %v3269_v57 = vpop.eup %3268 }
 0x32d   :  { %2462 = vst.msk [vmem:[%s4323_s7 + $0x30] sm:$0xff] %vm2461_vm0, %v3269_v57 }

</bundles_post_ra>
